<compile_context>
chip_gen: v7x
topology: tpu7x:2x2x1
jax: 0.10.0
libtpu: 0.0.40
codegen_flags: <defaults>
</compile_context>

<pallas_src>
import functools
import math

import jax
import jax.numpy as jnp
from jax.experimental import pallas as pl
from jax.experimental.pallas import tpu as pltpu


def _policy_kernel(no_tanh,
                   x_ref, w1_ref, b1_ref, w2_ref, b2_ref, w3_ref, b3_ref,
                   o_ref):
    """One batch tile of the Policy forward pass (all 3 linears + activations + squashing)."""
    x = x_ref[...]

    # Layer 1: Linear(7 -> H1) + ReLU.  Accumulate in f32; elementwise stays f32 (v5e has no
    # bf16 VPU), matmul inputs keep their storage dtype (bf16 hits the bf16 MXU path).
    h = jnp.dot(x, w1_ref[...], preferred_element_type=jnp.float32)
    h = jnp.maximum(h + b1_ref[...].astype(jnp.float32), 0.0)

    # Layer 2: Linear(H1 -> H2) + ReLU
    h = jnp.dot(h.astype(w2_ref.dtype), w2_ref[...], preferred_element_type=jnp.float32)
    h = jnp.maximum(h + b2_ref[...].astype(jnp.float32), 0.0)

    # Output layer: Linear(H2 -> nt), no activation inside build_relu_nn
    u = jnp.dot(h.astype(w3_ref.dtype), w3_ref[...], preferred_element_type=jnp.float32)
    u = u + b3_ref[...].astype(jnp.float32)

    if no_tanh:
        u = jnp.clip(u, -10.0, 10.0)
    else:
        u = jnp.tanh(u) * 10.0

    o_ref[...] = u.astype(o_ref.dtype)


def _round_up(x, m):
    return -(-x // m) * m


def policy_forward(x, params, *, no_tanh=False, block_b=1024, out_dtype=None):
    """Run the Policy forward pass as a batch-tiled Pallas TPU kernel.

    x: (B, 7) float32 or bfloat16
    params: dict with w1 (7,H1), b1 (1,H1), w2 (H1,H2), b2 (1,H2), w3 (H2,nt), b3 (1,nt)
    """
    B, K = x.shape
    H1 = params["w1"].shape[1]
    H2 = params["w2"].shape[1]
    nt = params["w3"].shape[1]
    out_dtype = x.dtype if out_dtype is None else out_dtype

    # Batch tile: as large as reasonable (per-grid-step overhead ~0.35us).  Multiple of 16 so
    # both f32 (8-sublane) and bf16 (16-sublane packed) layouts are fully aligned.
    TB = _round_up(min(block_b, B), 16)
    B_pad = _round_up(B, TB)
    x_in = jnp.pad(x, ((0, B_pad - B), (0, 0))) if B_pad != B else x
    grid = (B_pad // TB,)

    kernel = functools.partial(_policy_kernel, no_tanh)

    # Weights/biases: full-extent blocks with constant index maps -> DMA'd once, VMEM-resident.
    def _const_spec(a):
        return pl.BlockSpec(a.shape, lambda i: (0, 0))

    in_specs = [
        pl.BlockSpec((TB, K), lambda i: (i, 0)),          # x tile, pipelined over the grid
        _const_spec(params["w1"]), _const_spec(params["b1"]),
        _const_spec(params["w2"]), _const_spec(params["b2"]),
        _const_spec(params["w3"]), _const_spec(params["b3"]),
    ]
    # nt (=8) < 128 lanes -> masked partial stores; acceptable since output bytes are small and
    # TB is sublane-aligned.  (A fully lane-dense (nt, B) transposed layout would need wrapper
    # transposes that cost an extra HBM pass and defeat the purpose for this memory-bound op.)
    out_specs = pl.BlockSpec((TB, nt), lambda i: (i, 0))

    in_itemsize = jnp.dtype(x.dtype).itemsize
    out_itemsize = jnp.dtype(out_dtype).itemsize
    weight_bytes = sum(
        math.prod(params[k].shape) * jnp.dtype(params[k].dtype).itemsize
        for k in ("w1", "b1", "w2", "b2", "w3", "b3"))

    # 2x tiles for double buffering of x/out + resident weights + generous slack; keep the
    # request well under v7x's 64 MiB physical VMEM so the same kernel is portable.
    vmem_limit = int(min(
        max(4 * TB * (K * in_itemsize + nt * out_itemsize) + 4 * weight_bytes + (4 << 20),
            8 << 20),
        48 << 20))

    cost = pl.CostEstimate(
        flops=2 * B * (K * H1 + H1 * H2 + H2 * nt),
        transcendentals=0 if no_tanh else B * nt,
        bytes_accessed=B * (K * in_itemsize + nt * out_itemsize) + weight_bytes,
    )

    out = pl.pallas_call(
        kernel,
        out_shape=jax.ShapeDtypeStruct((B_pad, nt), out_dtype),
        grid=grid,
        in_specs=in_specs,
        out_specs=out_specs,
        compiler_params=pltpu.CompilerParams(
            dimension_semantics=("parallel",),   # batch tiles are independent; v7x: 2 TCs
            vmem_limit_bytes=vmem_limit,
        ),
        cost_estimate=cost,
    )(x_in, params["w1"], params["b1"], params["w2"], params["b2"],
      params["w3"], params["b3"])

    return out[:B] if B_pad != B else out


def init_params(key, in_dim=7, hiddens=(32, 32), nt=8):
    """Deterministic synthetic parameters (shapes follow build_relu_nn(7, nt, hiddens))."""
    dims = (in_dim,) + tuple(hiddens) + (nt,)
    keys = jax.random.split(key, 2 * (len(dims) - 1))
    params = {}
    for i in range(len(dims) - 1):
        fan_in, fan_out = dims[i], dims[i + 1]
        bound = 1.0 / jnp.sqrt(fan_in)
        params[f"w{i+1}"] = jax.random.uniform(
            keys[2 * i], (fan_in, fan_out), jnp.float32, -bound, bound)
        params[f"b{i+1}"] = jax.random.uniform(
            keys[2 * i + 1], (1, fan_out), jnp.float32, -bound, bound)
    return params


def policy_forward_ref(x, params, *, no_tanh=False):
    """Plain-JAX reference that mirrors the kernel's dtype/accumulation behaviour."""
    h = jnp.dot(x, params["w1"], preferred_element_type=jnp.float32)
    h = jnp.maximum(h + params["b1"].astype(jnp.float32), 0.0)
    h = jnp.dot(h.astype(params["w2"].dtype), params["w2"], preferred_element_type=jnp.float32)
    h = jnp.maximum(h + params["b2"].astype(jnp.float32), 0.0)
    u = jnp.dot(h.astype(params["w3"].dtype), params["w3"], preferred_element_type=jnp.float32)
    u = u + params["b3"].astype(jnp.float32)
    u = jnp.clip(u, -10.0, 10.0) if no_tanh else jnp.tanh(u) * 10.0
    return u.astype(x.dtype)


if __name__ == "__main__":
    key = jax.random.PRNGKey(0)
    pkey, xkey = jax.random.split(key)

    # Shapes implied by the module: state dim = 7, hiddens = (32, 32), nt = 8.
    params = init_params(pkey, in_dim=7, hiddens=(32, 32), nt=8)

    # 1) Tiny batch (exercises the pad-to-tile path), f32, strict check.
    x_small = jax.random.normal(xkey, (4, 7), jnp.float32)
    out_small = jax.block_until_ready(policy_forward(x_small, params))
    ref_small = policy_forward_ref(x_small, params)
    assert out_small.shape == (4, 8), out_small.shape
    assert jnp.allclose(out_small, ref_small, atol=1e-5, rtol=1e-5), "mismatch (small batch)"

    # 2) Multi-step grid (B=512 with 128-row tiles -> 4 grid steps), both output branches.
    x_big = jax.random.normal(jax.random.fold_in(xkey, 1), (512, 7), jnp.float32)
    out_big = jax.block_until_ready(policy_forward(x_big, params, block_b=128))
    ref_big = policy_forward_ref(x_big, params)
    assert jnp.allclose(out_big, ref_big, atol=1e-5, rtol=1e-5), "mismatch (tanh branch)"

    out_clip = jax.block_until_ready(policy_forward(x_big, params, no_tanh=True, block_b=128))
    ref_clip = policy_forward_ref(x_big, params, no_tanh=True)
    assert jnp.allclose(out_clip, ref_clip, atol=1e-5, rtol=1e-5), "mismatch (clip branch)"

    # 3) bf16 inputs/weights (halves HBM bytes on v6e/v7x); f32 accumulation inside the kernel.
    params_bf16 = {k: v.astype(jnp.bfloat16) for k, v in params.items()}
    x_bf16 = x_big.astype(jnp.bfloat16)
    out_bf16 = jax.block_until_ready(policy_forward(x_bf16, params_bf16, block_b=128))
    ref_bf16 = policy_forward_ref(x_bf16, params_bf16)
    assert out_bf16.dtype == jnp.bfloat16
    assert jnp.allclose(out_bf16.astype(jnp.float32), ref_bf16.astype(jnp.float32),
                        atol=5e-2, rtol=5e-2), "mismatch (bf16 path)"

    print("KERNEL_OK")
</pallas_src>

<mosaic_0001>
module attributes {stable_mosaic.version = 11 : i64} {
  func.func @_policy_kernel(%arg0: i32, %arg1: memref<16x7xf32, #tpu.memory_space<vmem>>, %arg2: memref<7x32xf32, #tpu.memory_space<vmem>>, %arg3: memref<1x32xf32, #tpu.memory_space<vmem>>, %arg4: memref<32x32xf32, #tpu.memory_space<vmem>>, %arg5: memref<1x32xf32, #tpu.memory_space<vmem>>, %arg6: memref<32x8xf32, #tpu.memory_space<vmem>>, %arg7: memref<1x8xf32, #tpu.memory_space<vmem>>, %arg8: memref<16x8xf32, #tpu.memory_space<vmem>>) attributes {dimension_semantics = [#tpu.dimension_semantics<parallel>], iteration_bounds = array<i64: 1>, scalar_prefetch = 0 : i64, scratch_operands = 0 : i64, tpu.core_type = #tpu.core_type<tc>, window_params = [{transform_indices = @transform_0, window_bounds = array<i64: 16, 7>}, {pipeline_mode = #tpu.pipeline_mode<synchronous>, transform_indices = @transform_1, window_bounds = array<i64: 7, 32>}, {pipeline_mode = #tpu.pipeline_mode<synchronous>, transform_indices = @transform_2, window_bounds = array<i64: 1, 32>}, {pipeline_mode = #tpu.pipeline_mode<synchronous>, transform_indices = @transform_3, window_bounds = array<i64: 32, 32>}, {pipeline_mode = #tpu.pipeline_mode<synchronous>, transform_indices = @transform_4, window_bounds = array<i64: 1, 32>}, {pipeline_mode = #tpu.pipeline_mode<synchronous>, transform_indices = @transform_5, window_bounds = array<i64: 32, 8>}, {pipeline_mode = #tpu.pipeline_mode<synchronous>, transform_indices = @transform_6, window_bounds = array<i64: 1, 8>}, {transform_indices = @transform_7, window_bounds = array<i64: 16, 8>}]} {
    %c0 = arith.constant 0 : index
    %c0_0 = arith.constant 0 : index
    %0 = vector.load %arg1[%c0, %c0_0] : memref<16x7xf32, #tpu.memory_space<vmem>>, vector<16x7xf32>
    %c0_1 = arith.constant 0 : index
    %c0_2 = arith.constant 0 : index
    %1 = vector.load %arg2[%c0_1, %c0_2] : memref<7x32xf32, #tpu.memory_space<vmem>>, vector<7x32xf32>
    %cst = arith.constant dense<0.000000e+00> : vector<16x32xf32>
    %2 = tpu.matmul %0, %1, %cst {dimension_numbers = #tpu.dot_dimension_numbers<[1], [0], [0], [1], [0, 0, 1, 1], [], []>} : vector<16x7xf32>, vector<7x32xf32>, vector<16x32xf32> -> vector<16x32xf32>
    %c0_3 = arith.constant 0 : index
    %c0_4 = arith.constant 0 : index
    %3 = vector.load %arg3[%c0_3, %c0_4] : memref<1x32xf32, #tpu.memory_space<vmem>>, vector<1x32xf32>
    %4 = vector.broadcast %3 : vector<1x32xf32> to vector<16x32xf32>
    %5 = arith.addf %2, %4 : vector<16x32xf32>
    %cst_5 = arith.constant 0.000000e+00 : f32
    %6 = vector.broadcast %cst_5 : f32 to vector<16x32xf32>
    %7 = arith.maximumf %5, %6 : vector<16x32xf32>
    %c0_6 = arith.constant 0 : index
    %c0_7 = arith.constant 0 : index
    %8 = vector.load %arg4[%c0_6, %c0_7] : memref<32x32xf32, #tpu.memory_space<vmem>>, vector<32x32xf32>
    %cst_8 = arith.constant dense<0.000000e+00> : vector<16x32xf32>
    %9 = tpu.matmul %7, %8, %cst_8 {dimension_numbers = #tpu.dot_dimension_numbers<[1], [0], [0], [1], [0, 0, 1, 1], [], []>} : vector<16x32xf32>, vector<32x32xf32>, vector<16x32xf32> -> vector<16x32xf32>
    %c0_9 = arith.constant 0 : index
    %c0_10 = arith.constant 0 : index
    %10 = vector.load %arg5[%c0_9, %c0_10] : memref<1x32xf32, #tpu.memory_space<vmem>>, vector<1x32xf32>
    %11 = vector.broadcast %10 : vector<1x32xf32> to vector<16x32xf32>
    %12 = arith.addf %9, %11 : vector<16x32xf32>
    %cst_11 = arith.constant 0.000000e+00 : f32
    %13 = vector.broadcast %cst_11 : f32 to vector<16x32xf32>
    %14 = arith.maximumf %12, %13 : vector<16x32xf32>
    %c0_12 = arith.constant 0 : index
    %c0_13 = arith.constant 0 : index
    %15 = vector.load %arg6[%c0_12, %c0_13] : memref<32x8xf32, #tpu.memory_space<vmem>>, vector<32x8xf32>
    %cst_14 = arith.constant dense<0.000000e+00> : vector<16x8xf32>
    %16 = tpu.matmul %14, %15, %cst_14 {dimension_numbers = #tpu.dot_dimension_numbers<[1], [0], [0], [1], [0, 0, 1, 1], [], []>} : vector<16x32xf32>, vector<32x8xf32>, vector<16x8xf32> -> vector<16x8xf32>
    %c0_15 = arith.constant 0 : index
    %c0_16 = arith.constant 0 : index
    %17 = vector.load %arg7[%c0_15, %c0_16] : memref<1x8xf32, #tpu.memory_space<vmem>>, vector<1x8xf32>
    %18 = vector.broadcast %17 : vector<1x8xf32> to vector<16x8xf32>
    %19 = arith.addf %16, %18 : vector<16x8xf32>
    %20 = math.tanh %19 : vector<16x8xf32>
    %cst_17 = arith.constant 1.000000e+01 : f32
    %21 = vector.broadcast %cst_17 : f32 to vector<16x8xf32>
    %22 = arith.mulf %20, %21 : vector<16x8xf32>
    %c0_18 = arith.constant 0 : index
    %c0_19 = arith.constant 0 : index
    %23 = vector.load %arg8[%c0_18, %c0_19] : memref<16x8xf32, #tpu.memory_space<vmem>>, vector<16x8xf32>
    tpu.vector_store %arg8[%c0_18, %c0_19], %22 {strides = array<i32>} : memref<16x8xf32, #tpu.memory_space<vmem>>, vector<16x8xf32>,
    return
  }
  func.func @transform_0(%arg0: i32) -> (i32, i32) {
    %c0_i32 = arith.constant 0 : i32
    %c0_i32_0 = arith.constant 0 : i32
    return %arg0, %c0_i32 : i32, i32
  }
  func.func @transform_1(%arg0: i32) -> (i32, i32) {
    %c0_i32 = arith.constant 0 : i32
    %c0_i32_0 = arith.constant 0 : i32
    %c0_i32_1 = arith.constant 0 : i32
    return %c0_i32, %c0_i32_0 : i32, i32
  }
  func.func @transform_2(%arg0: i32) -> (i32, i32) {
    %c0_i32 = arith.constant 0 : i32
    %c0_i32_0 = arith.constant 0 : i32
    %c0_i32_1 = arith.constant 0 : i32
    return %c0_i32, %c0_i32_0 : i32, i32
  }
  func.func @transform_3(%arg0: i32) -> (i32, i32) {
    %c0_i32 = arith.constant 0 : i32
    %c0_i32_0 = arith.constant 0 : i32
    %c0_i32_1 = arith.constant 0 : i32
    return %c0_i32, %c0_i32_0 : i32, i32
  }
  func.func @transform_4(%arg0: i32) -> (i32, i32) {
    %c0_i32 = arith.constant 0 : i32
    %c0_i32_0 = arith.constant 0 : i32
    %c0_i32_1 = arith.constant 0 : i32
    return %c0_i32, %c0_i32_0 : i32, i32
  }
  func.func @transform_5(%arg0: i32) -> (i32, i32) {
    %c0_i32 = arith.constant 0 : i32
    %c0_i32_0 = arith.constant 0 : i32
    %c0_i32_1 = arith.constant 0 : i32
    return %c0_i32, %c0_i32_0 : i32, i32
  }
  func.func @transform_6(%arg0: i32) -> (i32, i32) {
    %c0_i32 = arith.constant 0 : i32
    %c0_i32_0 = arith.constant 0 : i32
    %c0_i32_1 = arith.constant 0 : i32
    return %c0_i32, %c0_i32_0 : i32, i32
  }
  func.func @transform_7(%arg0: i32) -> (i32, i32) {
    %c0_i32 = arith.constant 0 : i32
    %c0_i32_0 = arith.constant 0 : i32
    return %arg0, %c0_i32 : i32, i32
  }
}

</mosaic_0001>

<bundles_post_ra>
// kernel: tpu_custom_call.1
= control target key start
LH: loop header
LB: loop body
LE: loop exit
PB: predicated region body
PF: predicated region fallthrough
CT: control target
= control target key end

     0   :  { %vm43_vm0 = vcmask 1046528   ;;  %vm36_vm1 = vcmask 56320   ;;  %vm135_vm2 = vcmask 261120   ;;  %vm315_vm3 = vcmask 64512   ;;  %s486_s1 = inlined_call_operand.vmem [shape: f32[7,32], index: 1, kind: input, shape index: {}]   ;;  %s487_s0 = inlined_call_operand.vmem [shape: f32[16,7], index: 0, kind: input, shape index: {}]   ;;  %s488_s3 = inlined_call_operand.vmem [shape: f32[32,32], index: 3, kind: input, shape index: {}]   ;;  %s489_s5 = inlined_call_operand.vmem [shape: f32[32,8], index: 5, kind: input, shape index: {}]   ;;  %s490_s2 = inlined_call_operand.vmem [shape: f32[1,32], index: 2, kind: input, shape index: {}]   ;;  %s491_s4 = inlined_call_operand.vmem [shape: f32[1,32], index: 4, kind: input, shape index: {}]   ;;  %s492_s6 = inlined_call_operand.vmem [shape: f32[1,8], index: 6, kind: input, shape index: {}]   ;;  %s493_s7 = inlined_call_operand.vmem [shape: f32[16,8], index: 7, kind: output, shape index: {}]  }
   0x1   :  { %v28_v0 = vld [vmem:[%s486_s1] sm:$0x7f]  ;;  %v27_v2 = vld [vmem:[%s487_s0 + $0x8] sm:$0xff]  ;;  %v126_v6 = vld [vmem:[%s488_s3 + $0x10] sm:$0xff] }
   0x2   :  { %v26_v1 = vld [vmem:[%s487_s0] sm:$0xff]  ;;  %347 = vmatprep.subr.msk.mxu0 %vm43_vm0, %v28_v0  ;;  %v125_v4 = vld [vmem:[%s488_s3 + $0x8] sm:$0xff]  ;;  %v127_v7 = vld [vmem:[%s488_s3 + $0x18] sm:$0xff] }
   0x3   :  { %349 = vmatprep.mubr.msk.f32.mxu0 %vm36_vm1, %v26_v1  ;;  %v124_v3 = vld [vmem:[%s488_s3] sm:$0xff]  ;;  %348 = vmatpush3.msk.msra.mxu0 %vm43_vm0, %v28_v0  ;;  %v378_v8 = vpack.c.bf16 %v127_v7, %v126_v6  ;;  %v220_v10 = vld [vmem:[%s489_s5 + $0x8] sm:$0xff]  ;;  %v221_v19 = vld [vmem:[%s489_s5 + $0x10] sm:$0xff] }
   0x4   :  { %v374_v5 = vpack.c.bf16 %v125_v4, %v124_v3  ;;  %350 = vmatmul.mubr.msk.f32.vlgmr.msra.gmra.mrb[0].mxu0 %vm36_vm1, %v27_v2  ;;  %v219_v9 = vld [vmem:[%s489_s5] sm:$0xff]  ;;  %v222_v20 = vld [vmem:[%s489_s5 + $0x18] sm:$0xff] }
   0x5   :  { %v382_v11 = vpack.c.bf16 %v220_v10, %v219_v9  ;;  %v322_v12 = vld [vmem:[%s490_s2] ss:$0 sm:$0xff]  ;;  %v386_v21 = vpack.c.bf16 %v222_v20, %v221_v19 }
   0x6   :  { %375 = vmatprep.subr.bf16.mxu1 %v374_v5  ;;  %v326_v22 = vld [vmem:[%s491_s4] ss:$0 sm:$0xff] }
   0x7   :  { %377 = vmatpush3.bf16.msra.mxu1 %v374_v5  ;;  %383 = vmatprep.subr.bf16.mxu0 %v382_v11  ;;  %v329_v29 = vld [vmem:[%s492_s6] ss:$0 sm:$0xff] }
   0x8   :  { %379 = vmatprep.subr.bf16.mxu1 %v378_v8  ;;  %385 = vmatpush3.bf16.msra.mxu0 %v382_v11 }
   0x9   :  { %387 = vmatprep.subr.bf16.mxu0 %v386_v21 }
   0xb   :  { %381 = vmatpush3.bf16.msra.mxu1 %v378_v8 }
   0xc   :  { %389 = vmatpush3.bf16.msra.mxu0 %v386_v21 }
  0xd7   :  { %v351_v13 = vpop.f32.mrb[0].mxu0 }
  0xd8   :  { %v119_v14 = vadd.f32 %v351_v13, %v322_v12  ;;  %v113_v15 = vpop.f32.mrb[1].mxu0 }
  0xd9   :  { %v114_v16 = vadd.f32 %v322_v12, %v113_v15 }
  0xda   :  { %v123_v18 = vmax.f32 %v119_v14, 0.0 }
  0xdb   :  { %v122_v17 = vmax.f32 %v114_v16, 0.0 }
  0xdd   :  { %360 = vmatprep.mubr.msk.f32.mxu1 %vm135_vm2, %v122_v17 }
  0xde   :  { %361 = vmatmul.mubr.msk.f32.vlgmr.msra.gmra.mrb[0].mxu1 %vm135_vm2, %v123_v18 }
 0x1b1   :  { %v362_v23 = vpop.f32.mrb[0].mxu1 }
 0x1b2   :  { %v214_v24 = vadd.f32 %v362_v23, %v326_v22  ;;  %v208_v25 = vpop.f32.mrb[1].mxu1 }
 0x1b3   :  { %v209_v26 = vadd.f32 %v326_v22, %v208_v25 }
 0x1b4   :  { %v218_v28 = vmax.f32 %v214_v24, 0.0 }
 0x1b5   :  { %v217_v27 = vmax.f32 %v209_v26, 0.0 }
 0x1b7   :  { %371 = vmatprep.mubr.msk.f32.mxu0 %vm135_vm2, %v217_v27 }
 0x1b8   :  { %372 = vmatmul.mubr.msk.f32.vlgmr.msra.gmra.mrb[2].mxu0 %vm135_vm2, %v218_v28 }
 0x28b   :  { %v373_v30 = vpop.f32.mrb[2].mxu0 }
 0x28c   :  { %v308_v31 = vadd.f32 %v373_v30, %v329_v29  ;;  %v302_v32 = vpop.f32.mrb[3].mxu0 }
 0x28d   :  { %v303_v33 = vadd.f32 %v329_v29, %v302_v32 }
 0x28e   :  { %390 = vtanh.f32 %v308_v31 }
 0x28f   :  { %392 = vtanh.f32 %v303_v33 }
 0x298   :  { %v391_v34 = vpop.eup %390 }
 0x299   :  { %v393_v35 = vpop.eup %392  ;;  %v314_v36 = vmul.f32 10.0, %v391_v34 }
 0x29a   :  { %v313_v37 = vmul.f32 10.0, %v393_v35 }
 0x29b   :  { %317 = vst.msk [vmem:[%s493_s7 + $0x8] sm:$0xff] %vm315_vm3, %v314_v36 }
 0x29c   :  { %316 = vst.msk [vmem:[%s493_s7] sm:$0xff] %vm315_vm3, %v313_v37 }

</bundles_post_ra>
